<compile_context>
chip_gen: v7x
topology: tpu7x:2x2x1
jax: 0.10.0
libtpu: 0.0.40
codegen_flags: <defaults>
</compile_context>

<pallas_src>
import functools
import numpy as np

import jax
import jax.numpy as jnp
from jax.experimental import pallas as pl
from jax.experimental.pallas import tpu as pltpu


MATMUL_DTYPE = jnp.bfloat16     # MXU operand dtype for conv weights / activations
ACT_DTYPE = jnp.bfloat16        # inter-layer activation storage dtype
DFT_DTYPE = jnp.float32         # GCC-PHAT DFT bases & spectral math (accuracy)


def _round_up(x, m):
    return ((x + m - 1) // m) * m


def _cdiv(a, b):
    return -(-a // b)


def _vmem_limit(entries):
    """entries: (shape, dtype, n_buffers).  Rough scoped-VMEM request for one call."""
    est = sum(int(np.prod(s)) * np.dtype(d).itemsize * n for s, d, n in entries)
    return int(min(48 << 20, max(16 << 20, 2 * est + (4 << 20))))


def _chunking(k, cin):
    """Tap-chunk size for the valid conv: sublane-aligned, ~128-row contraction."""
    kpad = _round_up(k, 8)
    kc = max(8, _round_up(max(1, 128 // max(cin, 1)), 8))
    kc = min(kc, kpad, 128)
    return kc, _cdiv(kpad, kc)


# Grid-invariant operands are single-buffered to save VMEM (v7x has 64 MiB per TC).
try:
    _ = pl.BlockSpec((8, 128), lambda i: (0, 0), pipeline_mode=pl.Buffered(1))
    _HAS_BUFFERED = True
except Exception:                                   # older jax without pipeline_mode
    _HAS_BUFFERED = False


def _invariant_spec(block_shape, index_map):
    if _HAS_BUFFERED:
        return pl.BlockSpec(block_shape, index_map, pipeline_mode=pl.Buffered(1))
    return pl.BlockSpec(block_shape, index_map)


# ----------------------------- Pallas kernels ------------------------------

def _conv1d_valid_kernel(x_ref, w_ref, scale_ref, shift_ref, o_ref, *scratch,
                         taps_per_chunk, n_chunks, neg_slope):
    """Valid Conv1d + BN affine + LeakyReLU, accumulated over tap-chunks.

    x_ref:     (1, Cin, Lpad)            one batch element (Lpad >= L, padded taps)
    w_ref:     (1, Cout, KC*Cin)         bf16, chunk j of the packed weights
    scale_ref: (Cout, 1)  shift_ref: (Cout, 1)     BN affine (conv bias folded in)
    o_ref:     (1, Cout, Lout)           Lout = L - K + 1
    scratch:   () if n_chunks == 1 else (f32 (Cout, Lout) accumulator,)
    """
    l_out = o_ref.shape[-1]

    def epilogue(acc):
        acc = acc * scale_ref[...] + shift_ref[...]
        if neg_slope != 1.0:                      # skip the select on 'linear' layers
            acc = jnp.where(acc >= 0.0, acc, neg_slope * acc)
        o_ref[0] = acc.astype(o_ref.dtype)

    if n_chunks == 1:
        x = x_ref[0]                                             # (Cin, Lpad)
        cols = [x[:, k:k + l_out] for k in range(taps_per_chunk)]
        slab = cols[0] if taps_per_chunk == 1 else jnp.concatenate(cols, axis=0)
        epilogue(jnp.dot(w_ref[0], slab, preferred_element_type=jnp.float32))
    else:
        acc_ref = scratch[0]
        j = pl.program_id(1)

        @pl.when(j == 0)
        def _():
            acc_ref[...] = jnp.zeros_like(acc_ref)

        base = pl.multiple_of(j * taps_per_chunk, taps_per_chunk)
        cols = [x_ref[0, :, pl.ds(base + k, l_out)] for k in range(taps_per_chunk)]
        slab = cols[0] if taps_per_chunk == 1 else jnp.concatenate(cols, axis=0)
        acc_ref[...] += jnp.dot(w_ref[0], slab, preferred_element_type=jnp.float32)

        @pl.when(j == pl.num_programs(1) - 1)
        def _():
            epilogue(acc_ref[...])


def _conv1d_same_kernel(x_ref, w_ref, scale_ref, shift_ref, o_ref, *,
                        n_taps, left, width, neg_slope):
    """'same'-padded Conv1d (+BN+LeakyReLU) on lane-padded 128-wide tiles.

    x_ref:  (Bblk, Cin, 128) bf16 -- columns >= width are guaranteed zero, so the
            'same' zero padding is a pure lane rotation (pltpu.roll wraps zeros in).
    w_ref:  (Cout, K*Cin) bf16
    o_ref:  (Bblk, Cout, 128) -- tail columns re-zeroed with an iota mask.
    """
    wp = x_ref.shape[-1]
    cout = o_ref.shape[1]
    keep = jax.lax.broadcasted_iota(jnp.int32, (cout, wp), 1) < width
    w = w_ref[...]
    scale = scale_ref[...]
    shift = shift_ref[...]
    for bi in range(x_ref.shape[0]):                      # small batch block, unrolled
        x = x_ref[bi]                                     # (Cin, 128)
        cols = []
        for k in range(n_taps):
            s = (left - k) % wp
            cols.append(x if s == 0 else pltpu.roll(x, shift=s, axis=1))
        slab = cols[0] if n_taps == 1 else jnp.concatenate(cols, axis=0)  # (K*Cin, 128)
        acc = jnp.dot(w, slab, preferred_element_type=jnp.float32)
        acc = acc * scale + shift
        if neg_slope != 1.0:
            acc = jnp.where(acc >= 0.0, acc, neg_slope * acc)
        acc = jnp.where(keep, acc, 0.0)                   # keep the zero tail exact
        o_ref[bi] = acc.astype(o_ref.dtype)


def _gcc_phat_kernel(y_ref, fwd_ref, inv_ref, o_ref, *, nfreq_pad, eps):
    """GCC-PHAT for one microphone pair (two adjacent batch rows).

    y_ref:   (2, C, T)       bf16, row 0 = y1, row 1 = y2
    fwd_ref: (T, 2*Fp)       f32  [cos | -sin] real-DFT basis, zero-padded columns
    inv_ref: (2*Fp, Wp)      f32  [wgt*cos ; -wgt*sin]/n inverse basis at the lags
                                  [-max_shift..max_shift]; columns >= width are zero
    o_ref:   (1, C, Wp)      columns >= width come out exactly zero
    """
    c = y_ref.shape[1]
    yy = y_ref[...]
    ys = yy.reshape(2 * c, yy.shape[-1]).astype(fwd_ref.dtype)          # (2C, T) f32
    spec = jnp.dot(ys, fwd_ref[...], preferred_element_type=jnp.float32)  # (2C, 2Fp)
    xr = spec[:c, :nfreq_pad]
    xi = spec[:c, nfreq_pad:]
    yr = spec[c:, :nfreq_pad]
    yi = spec[c:, nfreq_pad:]
    gr = xr * yr + xi * yi                                 # Gxy = X * conj(Y)
    gi = xi * yr - xr * yi
    # PHAT weighting ~ 1 / (|Gxy| + eps), fused into a single EUP rsqrt.
    phi = jax.lax.rsqrt(gr * gr + gi * gi + eps * eps)
    wri = jnp.concatenate([gr * phi, gi * phi], axis=1)                 # (C, 2Fp)
    o_ref[0] = jnp.dot(wri, inv_ref[...],
                       preferred_element_type=jnp.float32).astype(o_ref.dtype)


# ------------------------------- wrappers -----------------------------------

def conv1d_valid(x, layer):
    """Valid Conv1d + folded BatchNorm + LeakyReLU.  x: (B, Cin, L) bf16."""
    B, Cin, L = x.shape
    k, kc, n_chunks = layer['k'], layer['kc'], layer['n_chunks']
    kpad = kc * n_chunks
    Cout = layer['w'].shape[1]
    Lout = L - k + 1
    if kpad > k:                      # keep padded-tap im2col slices in bounds
        x = jnp.pad(x, ((0, 0), (0, 0), (0, kpad - k)))
    Lpad = L + kpad - k

    kernel = functools.partial(_conv1d_valid_kernel, taps_per_chunk=kc,
                               n_chunks=n_chunks, neg_slope=layer['neg_slope'])
    scratch = [] if n_chunks == 1 else [pltpu.VMEM((Cout, Lout), jnp.float32)]
    vmem = _vmem_limit([
        ((1, Cin, Lpad), ACT_DTYPE, 2),
        ((1, Cout, kc * Cin), MATMUL_DTYPE, 2),
        ((Cout, 1), jnp.float32, 2),
        ((1, Cout, Lout), ACT_DTYPE, 2),
        ((Cout, Lout), jnp.float32, 0 if n_chunks == 1 else 1),
    ])
    return pl.pallas_call(
        kernel,
        out_shape=jax.ShapeDtypeStruct((B, Cout, Lout), ACT_DTYPE),
        grid=(B, n_chunks),
        in_specs=[
            pl.BlockSpec((1, Cin, Lpad), lambda b, j: (b, 0, 0)),
            pl.BlockSpec((1, Cout, kc * Cin), lambda b, j: (j, 0, 0)),
            _invariant_spec((Cout, 1), lambda b, j: (0, 0)),
            _invariant_spec((Cout, 1), lambda b, j: (0, 0)),
        ],
        out_specs=pl.BlockSpec((1, Cout, Lout), lambda b, j: (b, 0, 0)),
        scratch_shapes=scratch,
        compiler_params=pltpu.CompilerParams(
            dimension_semantics=("parallel", "arbitrary"),
            vmem_limit_bytes=vmem),
    )(x, layer['w'], layer['scale'], layer['shift'])


def conv1d_same(x, layer, *, width, out_dtype):
    """'same'-padded Conv1d (+BN+LeakyReLU) over a lane-padded (B, Cin, 128) signal."""
    B, Cin, Wp = x.shape
    k = layer['k']
    Cout = layer['w'].shape[0]
    left = (k - 1) // 2
    assert width + k - 1 <= Wp          # roll-based zero padding stays inside 128 lanes
    b_blk = next(d for d in (8, 4, 2, 1) if B % d == 0)

    kernel = functools.partial(_conv1d_same_kernel, n_taps=k, left=left,
                               width=width, neg_slope=layer['neg_slope'])
    vmem = _vmem_limit([
        ((b_blk, Cin, Wp), ACT_DTYPE, 2),
        ((Cout, k * Cin), MATMUL_DTYPE, 1),
        ((Cout, 1), jnp.float32, 2),
        ((b_blk, Cout, Wp), out_dtype, 2),
    ])
    return pl.pallas_call(
        kernel,
        out_shape=jax.ShapeDtypeStruct((B, Cout, Wp), out_dtype),
        grid=(B // b_blk,),
        in_specs=[
            pl.BlockSpec((b_blk, Cin, Wp), lambda i: (i, 0, 0)),
            _invariant_spec((Cout, k * Cin), lambda i: (0, 0)),
            _invariant_spec((Cout, 1), lambda i: (0, 0)),
            _invariant_spec((Cout, 1), lambda i: (0, 0)),
        ],
        out_specs=pl.BlockSpec((b_blk, Cout, Wp), lambda i: (i, 0, 0)),
        compiler_params=pltpu.CompilerParams(
            dimension_semantics=("parallel",),
            vmem_limit_bytes=vmem),
    )(x, layer['w'], layer['scale'], layer['shift'])


@functools.lru_cache(maxsize=None)
def _gcc_bases(t, max_shift):
    """Real-DFT bases for GCC-PHAT, cached per (T, max_shift), lane-padded columns."""
    n = 2 * t
    nfreq = n // 2 + 1
    nfreq_pad = _round_up(nfreq, 128)
    width = 2 * max_shift + 1
    width_pad = _round_up(width, 128)

    tt = np.arange(t)
    f = np.arange(nfreq)
    ang = 2.0 * np.pi * np.outer(tt, f) / n
    fwd = np.zeros((t, 2 * nfreq_pad), np.float32)
    fwd[:, :nfreq] = np.cos(ang)
    fwd[:, nfreq_pad:nfreq_pad + nfreq] = -np.sin(ang)

    lags = np.concatenate([np.arange(n - max_shift, n), np.arange(0, max_shift + 1)])
    iang = 2.0 * np.pi * np.outer(f, lags) / n
    wgt = np.full((nfreq, 1), 2.0)
    wgt[0, 0] = 1.0
    wgt[-1, 0] = 1.0                                      # n = 2T is even -> Nyquist bin
    inv = np.zeros((2 * nfreq_pad, width_pad), np.float32)
    inv[:nfreq, :width] = wgt * np.cos(iang) / n
    inv[nfreq_pad:nfreq_pad + nfreq, :width] = -wgt * np.sin(iang) / n
    return jnp.asarray(fwd, DFT_DTYPE), jnp.asarray(inv, DFT_DTYPE)


def gcc_phat(y, *, max_tau, eps=1e-3):
    """y: (2B, C, T) bf16, microphone pairs in adjacent rows.

    Returns ((B, C, width_pad) bf16 with exact-zero tail columns, width)."""
    two_b, C, T = y.shape
    B = two_b // 2
    n = 2 * T
    nfreq = n // 2 + 1
    max_shift = int(min(max_tau, n // 2))
    width = 2 * max_shift + 1
    nfreq_pad = _round_up(nfreq, 128)
    width_pad = _round_up(width, 128)
    fwd, inv = _gcc_bases(T, max_shift)

    kernel = functools.partial(_gcc_phat_kernel, nfreq_pad=nfreq_pad, eps=eps)
    vmem = _vmem_limit([
        ((2, C, T), ACT_DTYPE, 2),
        ((T, 2 * nfreq_pad), DFT_DTYPE, 1),
        ((2 * nfreq_pad, width_pad), DFT_DTYPE, 1),
        ((1, C, width_pad), ACT_DTYPE, 2),
        ((2 * C, 2 * nfreq_pad), jnp.float32, 1),        # in-kernel spectrum value
    ])
    out = pl.pallas_call(
        kernel,
        out_shape=jax.ShapeDtypeStruct((B, C, width_pad), ACT_DTYPE),
        grid=(B,),
        in_specs=[
            pl.BlockSpec((2, C, T), lambda b: (b, 0, 0)),
            _invariant_spec((T, 2 * nfreq_pad), lambda b: (0, 0)),
            _invariant_spec((2 * nfreq_pad, width_pad), lambda b: (0, 0)),
        ],
        out_specs=pl.BlockSpec((1, C, width_pad), lambda b: (b, 0, 0)),
        compiler_params=pltpu.CompilerParams(
            dimension_semantics=("parallel",),
            vmem_limit_bytes=vmem),
    )(y, fwd, inv)
    return out, width


# ------------------------------ parameters ----------------------------------

def make_params(key, *, num_channels):
    # TODO(synk): the SincNet backbone class is not provided; its 4 conv blocks are
    # reproduced as plain Conv1d + BatchNorm + activation layers with demo-scaled
    # filter lengths (stand-ins for [1023, 11, 9, 7]); sinc-parameterized filters are
    # omitted.  At K=1023 the chunked grid-reduction path (kc=128, 8 chunks) is used.
    backbone_channels = [1, 8, 8, 8, num_channels]
    backbone_kernels = [9, 7, 5, 3]
    backbone_slopes = [0.2, 0.2, 0.2, 1.0]      # 'leaky_relu' x3, then 'linear'
    mlp_channels = [num_channels, 16, 16, 16]   # small stand-in for [*, 128, 128, 128]
    mlp_kernels = [11, 9, 7]
    final_kernel = 5

    n_keys = 2 * (len(backbone_kernels) + len(mlp_kernels)) + 1
    keys = iter(jax.random.split(key, n_keys))

    def conv_init(k_, cout, cin, ksz):
        kw, kb = jax.random.split(k_)
        bound = 1.0 / np.sqrt(cin * ksz)        # PyTorch Conv1d default init
        w = jax.random.uniform(kw, (cout, cin, ksz), jnp.float32, -bound, bound)
        b = jax.random.uniform(kb, (cout,), jnp.float32, -bound, bound)
        return w, b.reshape(cout, 1)

    def bn_init(k_, c, eps=1e-5):
        kg, kb2 = jax.random.split(k_)
        gamma = 1.0 + 0.1 * jax.random.normal(kg, (c,), jnp.float32)
        beta = 0.1 * jax.random.normal(kb2, (c,), jnp.float32)
        mean = jnp.zeros((c,), jnp.float32)
        var = jnp.ones((c,), jnp.float32)
        scale = gamma / jnp.sqrt(var + eps)
        shift = beta - mean * scale
        return scale.reshape(c, 1), shift.reshape(c, 1)

    def backbone_layer(cout, cin, ksz, slope):
        w, b = conv_init(next(keys), cout, cin, ksz)
        scale, shift = bn_init(next(keys), cout)
        kc, n_chunks = _chunking(ksz, cin)
        kpad = kc * n_chunks
        wpad = jnp.zeros((cout, cin, kpad), jnp.float32).at[:, :, :ksz].set(w)
        # -> (n_chunks, Cout, KC*Cin), row index within a chunk = k_local*Cin + cin
        wpacked = (wpad.reshape(cout, cin, n_chunks, kc)
                   .transpose(2, 0, 3, 1)
                   .reshape(n_chunks, cout, kc * cin).astype(MATMUL_DTYPE))
        # fold the conv bias into the BN shift: bn(conv+b) = scale*conv + (shift+scale*b)
        return dict(w=wpacked, scale=scale, shift=shift + scale * b,
                    k=ksz, kc=kc, n_chunks=n_chunks, neg_slope=slope)

    def mlp_layer(cout, cin, ksz, slope, with_bn=True):
        w, b = conv_init(next(keys), cout, cin, ksz)
        if with_bn:
            scale, shift = bn_init(next(keys), cout)
            shift = shift + scale * b
        else:
            scale = jnp.ones((cout, 1), jnp.float32)
            shift = b
        wflat = jnp.transpose(w, (0, 2, 1)).reshape(cout, ksz * cin).astype(MATMUL_DTYPE)
        return dict(w=wflat, scale=scale, shift=shift, k=ksz, neg_slope=slope)

    backbone = [backbone_layer(backbone_channels[i + 1], backbone_channels[i], ksz,
                               backbone_slopes[i])
                for i, ksz in enumerate(backbone_kernels)]
    mlp = [mlp_layer(mlp_channels[i + 1], mlp_channels[i], ksz, 0.2)
           for i, ksz in enumerate(mlp_kernels)]
    final = mlp_layer(1, mlp_channels[-1], final_kernel, 1.0, with_bn=False)
    return dict(backbone=backbone, mlp=mlp, final=final)


# -------------------------------- forward -----------------------------------

def ngcc_phat_forward(params, x1, x2, *, max_tau):
    """x1, x2: (B, sig_len) raw waveforms.  head='classifier', eval mode."""
    B, L = x1.shape
    # Interleave the two microphones along the batch axis so a single backbone sweep
    # processes both (feeding both v7x TensorCores) and GCC pairs sit in adjacent rows.
    x = jnp.stack([x1, x2], axis=1).reshape(2 * B, 1, L).astype(ACT_DTYPE)

    for layer in params['backbone']:   # valid convs; max_pool_len == 1 -> no pooling
        x = conv1d_valid(x, layer)

    cc, width = gcc_phat(x, max_tau=max_tau)   # (B, C, 128) bf16, tail columns zero

    for layer in params['mlp']:                # Dropout(0.5) is identity in eval mode
        cc = conv1d_same(cc, layer, width=width, out_dtype=ACT_DTYPE)
    cc = conv1d_same(cc, params['final'], width=width, out_dtype=jnp.float32)

    # TODO(synk): head == 'regression' branch (BatchNorm1d + LeakyReLU + Linear) not
    # implemented since the default head is 'classifier'.
    return cc[:, 0, :width]                    # single slice at the very end


# ---------------------------------- main -------------------------------------

if __name__ == "__main__":
    B = 2
    SIG_LEN = 64        # small stand-in for sig_len = 2048
    NUM_CHANNELS = 8    # small stand-in for num_channels = 128
    MAX_TAU = 10        # small stand-in for max_tau = 42

    root = jax.random.PRNGKey(0)
    kx1, kx2, kp = jax.random.split(root, 3)
    x1 = jax.random.normal(kx1, (B, SIG_LEN), jnp.float32)
    x2 = jax.random.normal(kx2, (B, SIG_LEN), jnp.float32)
    params = make_params(kp, num_channels=NUM_CHANNELS)

    out = ngcc_phat_forward(params, x1, x2, max_tau=MAX_TAU)
    out = jax.block_until_ready(out)

    assert out.shape == (B, 2 * MAX_TAU + 1), out.shape
    assert bool(jnp.all(jnp.isfinite(out)))
    print("KERNEL_OK")
</pallas_src>

<mosaic_0001>
module attributes {stable_mosaic.version = 11 : i64} {
  func.func @_conv1d_valid_kernel(%arg0: i32, %arg1: i32, %arg2: memref<1x1x71xbf16, #tpu.memory_space<vmem>>, %arg3: memref<1x8x16xbf16, #tpu.memory_space<vmem>>, %arg4: memref<8x1xf32, #tpu.memory_space<vmem>>, %arg5: memref<8x1xf32, #tpu.memory_space<vmem>>, %arg6: memref<1x8x56xbf16, #tpu.memory_space<vmem>>) attributes {dimension_semantics = [#tpu.dimension_semantics<parallel>, #tpu.dimension_semantics<arbitrary>], iteration_bounds = array<i64: 4, 1>, scalar_prefetch = 0 : i64, scratch_operands = 0 : i64, tpu.core_type = #tpu.core_type<tc>, window_params = [{transform_indices = @transform_0, window_bounds = array<i64: 1, 1, 71>}, {transform_indices = @transform_1, window_bounds = array<i64: 1, 8, 16>}, {pipeline_mode = #tpu.pipeline_mode<synchronous>, transform_indices = @transform_2, window_bounds = array<i64: 8, 1>}, {pipeline_mode = #tpu.pipeline_mode<synchronous>, transform_indices = @transform_3, window_bounds = array<i64: 8, 1>}, {transform_indices = @transform_4, window_bounds = array<i64: 1, 8, 56>}]} {
    %c0 = arith.constant 0 : index
    %c0_0 = arith.constant 0 : index
    %c0_1 = arith.constant 0 : index
    %0 = vector.load %arg2[%c0, %c0_0, %c0_1] : memref<1x1x71xbf16, #tpu.memory_space<vmem>>, vector<1x1x71xbf16>
    %1 = vector.shape_cast %0 : vector<1x1x71xbf16> to vector<1x71xbf16>
    %2 = vector.extract_strided_slice %1 {offsets = [0, 0], sizes = [1, 56], strides = [1, 1]} : vector<1x71xbf16> to vector<1x56xbf16>
    %3 = vector.extract_strided_slice %1 {offsets = [0, 1], sizes = [1, 56], strides = [1, 1]} : vector<1x71xbf16> to vector<1x56xbf16>
    %4 = vector.extract_strided_slice %1 {offsets = [0, 2], sizes = [1, 56], strides = [1, 1]} : vector<1x71xbf16> to vector<1x56xbf16>
    %5 = vector.extract_strided_slice %1 {offsets = [0, 3], sizes = [1, 56], strides = [1, 1]} : vector<1x71xbf16> to vector<1x56xbf16>
    %6 = vector.extract_strided_slice %1 {offsets = [0, 4], sizes = [1, 56], strides = [1, 1]} : vector<1x71xbf16> to vector<1x56xbf16>
    %7 = vector.extract_strided_slice %1 {offsets = [0, 5], sizes = [1, 56], strides = [1, 1]} : vector<1x71xbf16> to vector<1x56xbf16>
    %8 = vector.extract_strided_slice %1 {offsets = [0, 6], sizes = [1, 56], strides = [1, 1]} : vector<1x71xbf16> to vector<1x56xbf16>
    %9 = vector.extract_strided_slice %1 {offsets = [0, 7], sizes = [1, 56], strides = [1, 1]} : vector<1x71xbf16> to vector<1x56xbf16>
    %10 = vector.extract_strided_slice %1 {offsets = [0, 8], sizes = [1, 56], strides = [1, 1]} : vector<1x71xbf16> to vector<1x56xbf16>
    %11 = vector.extract_strided_slice %1 {offsets = [0, 9], sizes = [1, 56], strides = [1, 1]} : vector<1x71xbf16> to vector<1x56xbf16>
    %12 = vector.extract_strided_slice %1 {offsets = [0, 10], sizes = [1, 56], strides = [1, 1]} : vector<1x71xbf16> to vector<1x56xbf16>
    %13 = vector.extract_strided_slice %1 {offsets = [0, 11], sizes = [1, 56], strides = [1, 1]} : vector<1x71xbf16> to vector<1x56xbf16>
    %14 = vector.extract_strided_slice %1 {offsets = [0, 12], sizes = [1, 56], strides = [1, 1]} : vector<1x71xbf16> to vector<1x56xbf16>
    %15 = vector.extract_strided_slice %1 {offsets = [0, 13], sizes = [1, 56], strides = [1, 1]} : vector<1x71xbf16> to vector<1x56xbf16>
    %16 = vector.extract_strided_slice %1 {offsets = [0, 14], sizes = [1, 56], strides = [1, 1]} : vector<1x71xbf16> to vector<1x56xbf16>
    %17 = vector.extract_strided_slice %1 {offsets = [0, 15], sizes = [1, 56], strides = [1, 1]} : vector<1x71xbf16> to vector<1x56xbf16>
    %18 = tpu.concatenate %2, %3, %4, %5, %6, %7, %8, %9, %10, %11, %12, %13, %14, %15, %16, %17 in 0 : vector<1x56xbf16>, vector<1x56xbf16>, vector<1x56xbf16>, vector<1x56xbf16>, vector<1x56xbf16>, vector<1x56xbf16>, vector<1x56xbf16>, vector<1x56xbf16>, vector<1x56xbf16>, vector<1x56xbf16>, vector<1x56xbf16>, vector<1x56xbf16>, vector<1x56xbf16>, vector<1x56xbf16>, vector<1x56xbf16>, vector<1x56xbf16> -> vector<16x56xbf16>
    %c0_2 = arith.constant 0 : index
    %c0_3 = arith.constant 0 : index
    %c0_4 = arith.constant 0 : index
    %19 = vector.load %arg3[%c0_2, %c0_3, %c0_4] : memref<1x8x16xbf16, #tpu.memory_space<vmem>>, vector<1x8x16xbf16>
    %20 = vector.shape_cast %19 : vector<1x8x16xbf16> to vector<8x16xbf16>
    %cst = arith.constant dense<0.000000e+00> : vector<8x56xf32>
    %21 = tpu.matmul %20, %18, %cst {dimension_numbers = #tpu.dot_dimension_numbers<[1], [0], [0], [1], [0, 0, 1, 1], [], []>} : vector<8x16xbf16>, vector<16x56xbf16>, vector<8x56xf32> -> vector<8x56xf32>
    %c0_5 = arith.constant 0 : index
    %c0_6 = arith.constant 0 : index
    %22 = vector.load %arg4[%c0_5, %c0_6] : memref<8x1xf32, #tpu.memory_space<vmem>>, vector<8x1xf32>
    %23 = vector.broadcast %22 : vector<8x1xf32> to vector<8x56xf32>
    %24 = arith.mulf %21, %23 : vector<8x56xf32>
    %c0_7 = arith.constant 0 : index
    %c0_8 = arith.constant 0 : index
    %25 = vector.load %arg5[%c0_7, %c0_8] : memref<8x1xf32, #tpu.memory_space<vmem>>, vector<8x1xf32>
    %26 = vector.broadcast %25 : vector<8x1xf32> to vector<8x56xf32>
    %27 = arith.addf %24, %26 : vector<8x56xf32>
    %cst_9 = arith.constant 0.000000e+00 : f32
    %28 = vector.broadcast %cst_9 : f32 to vector<8x56xf32>
    %29 = arith.cmpf oge, %27, %28 : vector<8x56xf32>
    %cst_10 = arith.constant 2.000000e-01 : f32
    %30 = vector.broadcast %cst_10 : f32 to vector<8x56xf32>
    %31 = arith.mulf %30, %27 : vector<8x56xf32>
    %32 = arith.select %29, %27, %31 : vector<8x56xi1>, vector<8x56xf32>
    %33 = arith.truncf %32 : vector<8x56xf32> to vector<8x56xbf16>
    %c0_11 = arith.constant 0 : index
    %c0_12 = arith.constant 0 : index
    %c0_13 = arith.constant 0 : index
    %34 = vector.load %arg6[%c0_11, %c0_12, %c0_13] : memref<1x8x56xbf16, #tpu.memory_space<vmem>>, vector<1x8x56xbf16>
    %35 = vector.shape_cast %34 : vector<1x8x56xbf16> to vector<8x56xbf16>
    %36 = vector.shape_cast %33 : vector<8x56xbf16> to vector<1x8x56xbf16>
    tpu.vector_store %arg6[%c0_11, %c0_12, %c0_13], %36 {strides = array<i32>} : memref<1x8x56xbf16, #tpu.memory_space<vmem>>, vector<1x8x56xbf16>,
    return
  }
  func.func @transform_0(%arg0: i32, %arg1: i32) -> (i32, i32, i32) {
    %c0_i32 = arith.constant 0 : i32
    %c0_i32_0 = arith.constant 0 : i32
    %c0_i32_1 = arith.constant 0 : i32
    return %arg0, %c0_i32, %c0_i32_0 : i32, i32, i32
  }
  func.func @transform_1(%arg0: i32, %arg1: i32) -> (i32, i32, i32) {
    %c0_i32 = arith.constant 0 : i32
    %c0_i32_0 = arith.constant 0 : i32
    %c0_i32_1 = arith.constant 0 : i32
    return %arg1, %c0_i32, %c0_i32_0 : i32, i32, i32
  }
  func.func @transform_2(%arg0: i32, %arg1: i32) -> (i32, i32) {
    %c0_i32 = arith.constant 0 : i32
    %c0_i32_0 = arith.constant 0 : i32
    %c0_i32_1 = arith.constant 0 : i32
    return %c0_i32, %c0_i32_0 : i32, i32
  }
  func.func @transform_3(%arg0: i32, %arg1: i32) -> (i32, i32) {
    %c0_i32 = arith.constant 0 : i32
    %c0_i32_0 = arith.constant 0 : i32
    %c0_i32_1 = arith.constant 0 : i32
    return %c0_i32, %c0_i32_0 : i32, i32
  }
  func.func @transform_4(%arg0: i32, %arg1: i32) -> (i32, i32, i32) {
    %c0_i32 = arith.constant 0 : i32
    %c0_i32_0 = arith.constant 0 : i32
    %c0_i32_1 = arith.constant 0 : i32
    return %arg0, %c0_i32, %c0_i32_0 : i32, i32, i32
  }
}

</mosaic_0001>

<bundles_post_ra>
// kernel: tpu_custom_call.1
= control target key start
LH: loop header
LB: loop body
LE: loop exit
PB: predicated region body
PF: predicated region fallthrough
CT: control target
= control target key end

     0   :  { %9 = vsyncpa [#allocation3], 0  ;;  %s907_s0 = inlined_call_operand.vmem [shape: bf16[4,1,71], index: 0, kind: input, shape index: {}]   ;;  %s908_s1 = inlined_call_operand.vmem [shape: bf16[1,8,16], index: 1, kind: input, shape index: {}]   ;;  %s909_s2 = inlined_call_operand.vmem [shape: f32[8,1], index: 2, kind: input, shape index: {}]   ;;  %s910_s3 = inlined_call_operand.vmem [shape: f32[8,1], index: 3, kind: input, shape index: {}]   ;;  %s911_s4 = inlined_call_operand.hbm [shape: bf16[4,8,56], index: 4, kind: output, shape index: {}]  }
   0x1   :  { %11 = vsyncpa [#allocation3 + $0x1], 0  ;;  %s766_s15 = smov 0   ;;  %s768_s16 = smov 0  }
   0x2   :  { %s770_s17 = smov 0   ;;  %s772_s18 = smov 0  }
   0x3   :  { %s774_s19 = smov 0   ;;  %s776_s20 = smov 0  }
   0x4 LB: > { %s544_s21 = sadd.s32 4294967295, %s719_s20   ;;  %s545_s22 = sadd.s32 4294967294, %s719_s20   ;;  %s719_s20 = sphi %s776_s20, %s17_s20   ;;  %s715_s19 = sphi %s774_s19, %s918_s19   ;;  %s711_s18 = sphi %s772_s18, %s917_s18   ;;  %s707_s17 = sphi %s770_s17, %s916_s17   ;;  %s703_s16 = sphi %s768_s16, %s915_s16   ;;  %s699_s15 = sphi %s766_s15, %s914_s15  }
   0x5   : > { %s29_s23 = sadd.s32 1, %s715_s19  ;;  %s130_s24 = sadd.s32 1, %s707_s17 }
   0x6   : > { %p31_p0 = scmp.ge.s32.totalorder %s29_s23, 4  ;;  %p140_p1 = scmp.ne.s32.totalorder %s707_s17, %s703_s16 }
   0x7   : > { %p141_p2 = scmp.eq.s32.totalorder %s544_s21, 3  ;;  %p146_p3 = scmp.ne.s32.totalorder %s703_s16, %s699_s15 }
   0x8   : > { %s920_s23 = smov (%p31_p0, %s29_s23), 0  ;;  %p147_p5 = scmp.eq.s32.totalorder %s545_s22, 3 }
   0x9   : > { %p806_p4 = por %p141_p2, %p140_p1  ;;  %s127_s26 = ssub.s32 %s715_s19, %s920_s23 }
   0xa   : > { %p549_p6 = scmp.ge.s32.totalorder %s719_s20, 1  ;;  %p128_p7 = scmp.eq.s32.totalorder %s127_s26, 0 }
   0xb   : > { %p813_p8 = por %p147_p5, %p146_p3  ;;  %p184_p9 = scmp.lt.s32.totalorder %s719_s20, 5 }
   0xc   : > { %s819_s28 = scalar_select %p128_p7, %s707_s17, %s130_s24  }
   0xd   : > { %p185_p10 = pnand %p549_p6, %p184_p9 }
   0xe   : > { %p212_p11 = scmp.lt.s32.totalorder (!%p185_p10), %s711_s18, 3  ;;  %v225_v0 = vlaneseq (!%p185_p10)  ;;  %v721_v1 = vmov (!%p185_p10), 1966171168   ;;  %s722_s7 = smov (!%p185_p10), 126   ;;  %v730_v23 = vmov (!%p185_p10), 0.0   ;;  %vm733_vm0 = vmmov (!%p185_p10), 0  }
   0xf   : > { %188 = sbr.rel (%p185_p10) target bundleno = 414 (0x19e), region = 36  ;;  %v223_v2 = vunpack.c.l.s4 (!%p185_p10), %v721_v1  ;;  %s723_s8 = smov (!%p185_p10), 124   ;;  %558 = vmatprep.subr.bf16.mxu0 (!%p185_p10), %v730_v23  ;;  %560 = vmatprep.mubr.msk.bf16.mxu0 (!%p185_p10), %vm733_vm0, %v730_v23  ;;  %v735_v27 = vmov (!%p185_p10), 0   ;;  %v431_v30 = vld [vmem:[%s909_s2] sm:$0xff] (!%p185_p10)  ;;  %vm319_vm1 = vcmask (!%p185_p10), 1040384   ;;  %vm328_vm4 = vcmask (!%p185_p10), 1041408  }
  0x10   : > { %v226_v3 = vshrl.u32 (!%p185_p10), %v225_v0, 7  ;;  %s724_s9 = smov (!%p185_p10), 127   ;;  %s725_s10 = smov (!%p185_p10), 120   ;;  %638 = vset.pattern.permute.xlu1 (!%p185_p10), %v735_v27  ;;  %639 = vset.pattern.permute.xlu0 (!%p185_p10), %v735_v27  ;;  %v438_v31 = vld [vmem:[%s910_s3] sm:$0xff] (!%p185_p10)  ;;  %vm320_vm2 = vsmask.f32 (!%p185_p10), 256 }
  0x11   : > { %v224_v4 = vunpack.c.0.s8 (!%p185_p10), %v223_v2  ;;  %s726_s11 = smov (!%p185_p10), 123   ;;  %s727_s12 = smov (!%p185_p10), 122   ;;  %vm321_vm3 = vmand (!%p185_p10), %vm319_vm1, %vm320_vm2  ;;  %vm329_vm5 = vsmask.f32 (!%p185_p10), 1280  ;;  %vm337_vm6 = vcmask (!%p185_p10), 1042432   ;;  %vm346_vm9 = vcmask (!%p185_p10), 1043456  }
  0x12   : > { %s728_s13 = smov (!%p185_p10), 121   ;;  %s729_s14 = smov (!%p185_p10), 125   ;;  %vm338_vm7 = vsmask.f32 (!%p185_p10), 2304  ;;  %vm330_vm8 = vmand (!%p185_p10), %vm328_vm4, %vm329_vm5  ;;  %vm347_vm10 = vsmask.f32 (!%p185_p10), 3328 }
  0x13   : > { %v227_v6 = vsub.s32 (!%p185_p10), %v224_v4, %v226_v3  ;;  %s731_s21 = smov (!%p185_p10), 119   ;;  %s732_s22 = smov (!%p185_p10), 118   ;;  %vm339_vm11 = vmand (!%p185_p10), %vm337_vm6, %vm338_vm7  ;;  %vm355_vm12 = vcmask (!%p185_p10), 1044480   ;;  %vm356_vm13 = vsmask.f32 (!%p185_p10), 4352  ;;  %vm364_vm15 = vcmask (!%p185_p10), 1045504  }
  0x14   : > { %s734_s24 = smov (!%p185_p10), 117   ;;  %s736_s26 = smov (!%p185_p10), 116   ;;  %vm348_vm14 = vmand (!%p185_p10), %vm346_vm9, %vm347_vm10  ;;  %vm365_vm0 = vsmask.f32 (!%p185_p10), 5376  ;;  %vm374_vm5 = vsmask.f32 (!%p185_p10), 6400 }
  0x15   : > { %s738_s30 = smov (!%p185_p10), 114   ;;  %vm357_vm2 = vmand (!%p185_p10), %vm355_vm12, %vm356_vm13  ;;  %vm383_vm7 = vsmask.f32 (!%p185_p10), 7424  ;;  %v386_v62 = vld [vmem:[%s908_s1] sm:$0xf] (!%p185_p10) }
  0x16   : > { %s213_s29 = scalar_select %p212_p11, %s711_s18, 3 }
  0x18   : > { %s214_s6 = scalar_lea.vmem %s907_s0, %s213_s29  ;;  %s737_s29 = smov 115  }
  0x19   : > { %v826_v5 = vld [vmem:[%s214_s6] sm:$0x1] }
  0x1a   : > { %v242_v7 = vcombine.low %v826_v5, %v826_v5  ;;  %v228_v8 = vrot.slane %v826_v5, %v227_v6 }
  0x1c   : > { %v249_v9 = vrot.slane %v242_v7, %v227_v6  ;;  %v263_v10 = vcombine.low %v228_v8, %v228_v8  ;;  %v235_v11 = vrot.slane %v228_v8, %v227_v6 }
  0x1e   : > { %v256_v12 = vrot.slane %v249_v9, %v227_v6  ;;  %v270_v13 = vrot.slane %v263_v10, %v227_v6  ;;  %v237_v14 = vshll.u32 %v235_v11, 16  ;;  %v277_v15 = vcombine.low %v249_v9, %v249_v9 }
  0x1f   : > { %v291_v16 = vcombine.low %v235_v11, %v235_v11 }
  0x20   : > { %257 = vrot.lane.b32.xlu0 %v256_v12, %s722_s7  ;;  %271 = vrot.lane.b32.xlu1 %v270_v13, %s723_s8  ;;  %v273_v17 = vrot.slane %v237_v14, 6  ;;  %v284_v18 = vrot.slane %v277_v15, %v227_v6  ;;  %v287_v19 = vrot.slane %v237_v14, 5  ;;  %v259_v20 = vrot.slane %v237_v14, 7  ;;  %s739_s7 = smov 113  }
  0x21   : > { %v294_v21 = vrot.slane %v237_v14, 4  ;;  %v298_v22 = vcombine.low %v256_v12, %v256_v12  ;;  %v301_v24 = vrot.slane %v237_v14, 3  ;;  %v305_v25 = vcombine.low %v270_v13, %v270_v13 }
  0x22   : > { %v308_v26 = vrot.slane %v237_v14, 2  ;;  %v312_v28 = vcombine.low %v284_v18, %v284_v18  ;;  %v315_v29 = vrot.slane %v237_v14, 1 }
  0x24   : > { %239 = vrot.lane.b32.xlu0 %v237_v14, %s724_s9  ;;  %292 = vrot.lane.b32.xlu1 %v291_v16, %s725_s10 }
  0x28   : > { %274 = vrot.lane.b32.xlu0 %v273_v17, %s726_s11  ;;  %285 = vrot.lane.b32.xlu1 %v284_v18, %s727_s12  ;;  %s209_s12 = sand.u32 1, %s703_s16  }
  0x2c   : > { %288 = vrot.lane.b32.xlu0 %v287_v19, %s728_s13  ;;  %260 = vrot.lane.b32.xlu1 %v259_v20, %s729_s14  ;;  %s550_s13 = sshll.u32 %s209_s12, 2  ;;  %s553_s14 = sshll.u32 %s711_s18, 6 }
  0x2d   : > { %s740_s18 = smov [#allocation2]  }
  0x2e   : > { %s645_s6 = sshll.u32 %s740_s18, 4  ;;  %s646_s6 = int_to_ptr.vmem [resolvable:$false] %s645_s6 }
  0x30   : > { %295 = vrot.lane.b32.xlu0 %v294_v21, %s731_s21  ;;  %299 = vrot.lane.b32.xlu1 %v298_v22, %s732_s22  ;;  %s211_s21 = scalar_lea.vmem [#allocation2], %s550_s13 }
  0x31   : > { %s465_s22 = sshll.u32 %s211_s21, 4  ;;  %s862_s22 = int_to_ptr.vmem [resolvable:$true] %s465_s22 }
  0x32   : > { %s641_s5 = scalar_lea.vmem %s862_s22, 64  ;;  %p648_p1 = scmp.lt.s32.totalorder %s862_s22, %s646_s6 }
  0x33   : > { %p642_p12 = scmp.ne.s32.totalorder %s862_s22, %s641_s5 }
  0x34   : > { %302 = vrot.lane.b32.xlu0 %v301_v24, %s734_s24  ;;  %306 = vrot.lane.b32.xlu1 %v305_v25, %s736_s26 }
  0x35   : > { %p643_p13 = pnand %p642_p12, %p806_p4 }
  0x37   : > { %p644_p0 = pneg %p643_p13 }
  0x38   : > { %309 = vrot.lane.b32.xlu0 %v308_v26, %s737_s29  ;;  %313 = vrot.lane.b32.xlu1 %v312_v28, %s738_s30  ;;  %s860_s29 = scalar_lea.hbm %s911_s4, %s553_s14  ;;  %s452_s30 = scalar_lea.sflag [#allocation3], %s209_s12 }
  0x3c   : > { %316 = vrot.lane.b32.xlu0 %v315_v29, %s739_s7  ;;  %434 = vperm.xlu1 %638, %v431_v30   ;;  %s647_s7 = scalar_lea.vmem %s646_s6, 128 }
  0x3d   : > { %p649_p2 = scmp.lt.s32.totalorder %s647_s7, %s641_s5 }
  0x3f   : > { %p650_p3 = por %p649_p2, %p648_p1 }
  0x40   : > { %441 = vperm.xlu0 %639, %v438_v31  }
  0x41   : > { %p651_p5 = pnand %p650_p3, %p644_p0 }
  0x92   : > { %v258_v32 = vpop.permute.xlu0 %257  ;;  %v272_v33 = vpop.permute.xlu1 %271 }
  0x96   : > { %v240_v34 = vpop.permute.xlu0 %239  ;;  %v293_v35 = vpop.permute.xlu1 %292 }
  0x97   : > { %v322_v38 = vsel %vm321_vm3, %v826_v5, %v240_v34  ;;  %vm373_vm3 = vcmask 1046528  }
  0x98   : > { %v326_v40 = vsel %vm319_vm1, %v322_v38, %v258_v32  ;;  %vm366_vm1 = vmand %vm364_vm15, %vm365_vm0 }
  0x9a   : > { %v275_v36 = vpop.permute.xlu0 %274  ;;  %v286_v37 = vpop.permute.xlu1 %285 }
  0x9e   : > { %v289_v39 = vpop.permute.xlu0 %288  ;;  %v261_v41 = vpop.permute.xlu1 %260 }
  0x9f   : > { %v331_v42 = vsel %vm330_vm8, %v326_v40, %v261_v41 }
  0xa0   : > { %v335_v43 = vsel %vm328_vm4, %v331_v42, %v272_v33  ;;  %vm375_vm4 = vmand %vm373_vm3, %vm374_vm5 }
  0xa1   : > { %v340_v44 = vsel %vm339_vm11, %v335_v43, %v275_v36  ;;  %vm449_vm11 = vcmask 453632  }
  0xa2   : > { %v296_v45 = vpop.permute.xlu0 %295  ;;  %v344_v46 = vsel %vm337_vm6, %v340_v44, %v286_v37  ;;  %v300_v47 = vpop.permute.xlu1 %299  ;;  %vm382_vm6 = vcmask 1047552  }
  0xa3   : > { %v349_v48 = vsel %vm348_vm14, %v344_v46, %v289_v39  ;;  %vm384_vm8 = vmand %vm382_vm6, %vm383_vm7 }
  0xa4   : > { %v353_v49 = vsel %vm346_vm9, %v349_v48, %v293_v35  ;;  %vm387_vm9 = vcmask 130048  }
  0xa5   : > { %v358_v50 = vsel %vm357_vm2, %v353_v49, %v296_v45 }
  0xa6   : > { %v303_v51 = vpop.permute.xlu0 %302  ;;  %v362_v52 = vsel %vm355_vm12, %v358_v50, %v300_v47  ;;  %v307_v53 = vpop.permute.xlu1 %306 }
  0xa7   : > { %v367_v54 = vsel %vm366_vm1, %v362_v52, %v303_v51 }
  0xa8   : > { %v371_v55 = vsel %vm364_vm15, %v367_v54, %v307_v53 }
  0xaa   : > { %v310_v56 = vpop.permute.xlu0 %309  ;;  %v314_v58 = vpop.permute.xlu1 %313 }
  0xab   : > { %v376_v57 = vsel %vm375_vm4, %v371_v55, %v310_v56 }
  0xac   : > { %v380_v59 = vsel %vm373_vm3, %v376_v57, %v314_v58 }
  0xae   : > { %v317_v60 = vpop.permute.xlu0 %316 }
  0xaf   : > { %v385_v61 = vsel %vm384_vm8, %v380_v59, %v317_v60 }
  0xb0   : > { %559 = vmatpush3.bf16.msra.mxu0 %v385_v61 }
  0xb3   : > { %561 = vmatmul.mubr.msk.bf16.vlgmr.msra.gmra.mrb[0].mxu0 %vm387_vm9, %v386_v62 }
  0xbb   : > { %v435_v63 = vpop.permute.xlu1 %434 }
  0xbf   : > { %v442_v1 = vpop.permute.xlu0 %441 }
 0x186   : > { %v425_v0 = vpop.f32.mrb[0].mxu0 }
 0x187   : > { %v437_v2 = vmul.f32 %v435_v63, %v425_v0  ;;  %v562_v3 = vpop.f32.mrb[1].mxu0 }
 0x188   : > { %v428_v4 = vpop.f32.mrb[2].mxu0 }
 0x189   : > { %v444_v5 = vadd.f32 %v442_v1, %v437_v2  ;;  %v563_v6 = vpop.f32.mrb[3].mxu0 }
 0x18b   : > { %vm445_vm10 = vcmp.ge.f32.partialorder %v444_v5, 0.0  ;;  %v446_v7 = vmul.f32 0.2, %v444_v5 }
 0x18d   : > { %v447_v8 = vsel %vm445_vm10, %v444_v5, %v446_v7 }
 0x18e   : > { %v448_v9 = vpack.c.bf16 %v447_v8, %v447_v8 }
 0x190   : > { %450 = vst.msk [vmem:[%s211_s21] sm:$0xf] %vm449_vm11, %v448_v9 }
 0x191   : > { %654 = shalt.err (!%p651_p5)
}
 0x192   : > { %s655_s8 = scalar_lea.hbm %s860_s29, 64  ;;  %s659_s11 = scalar_lea.hbm %s911_s4, 256 }
 0x193   : > { %p656_p6 = scmp.ne.s32.totalorder %s860_s29, %s655_s8  ;;  %p660_p10 = scmp.lt.u32.totalorder %s860_s29, %s911_s4 }
 0x194   : > { %p661_p11 = scmp.lt.u32.totalorder %s659_s11, %s655_s8  ;;  %p663_p13 = scmp.lt.u32.totalorder %s655_s8, %s860_s29 }
 0x195   : > { %p657_p7 = pnand %p656_p6, %p806_p4 }
 0x196   : > { %p662_p12 = por %p661_p11, %p660_p10 }
 0x197   : > { %p658_p9 = pneg %p657_p7 }
 0x198   : > { %p664_p0 = por %p663_p13, %p662_p12 }
 0x19a   : > { %p665_p1 = pnand %p664_p0, %p658_p9 }
 0x19c   : > { %668 = shalt.err (!%p665_p1)
}
 0x19d   : > { %564 = dma.vmem_to_hbm [thread:$0]  (%p806_p4), %s862_s22, 64, %s860_s29, %s452_s30  }
 0x19e PF: > { %p570_p2 = scmp.ge.s32.totalorder %s719_s20, 2  ;;  %s477_s14 = sand.u32 1, %s699_s15  }
 0x19f   : > { %s478_s21 = scalar_lea.sflag [#allocation3], %s477_s14 }
 0x1a0   : > { %p567_p3 = pnand %p570_p2, %p813_p8 }
 0x1a2   : > { %694 = dma.done.wait (!%p567_p3), %s478_s21, 64  }
 0x1a3   : > { %696 = vsyncadd (!%p567_p3), %s478_s21, 4294967232  ;;  %s17_s20 = sadd.s32 1, %s719_s20   ;;  %s914_s15 = smov %s703_s16 }
 0x1a4   : > { %p14_p5 = scmp.ge.s32.totalorder %s17_s20, 6   ;;  %s915_s16 = smov %s707_s17 }
 0x1a5   : > { %s916_s17 = smov %s819_s28  ;;  %s917_s18 = smov %s715_s19 }
 0x1a6   : > { %s918_s19 = smov %s920_s23  ;;  %16 = sbr.rel (!%p14_p5) target bundleno = 4 (0x4), region = 74 }
 0x1ad   :  { %483 = vsyncpa [#allocation3], 1 }
 0x1ae   :  { %485 = vsyncpa [#allocation3 + $0x1], 1 }

</bundles_post_ra>
